<compile_context>
chip_gen: v7x
topology: tpu7x:2x2x1
jax: 0.10.0
libtpu: 0.0.40
codegen_flags: <defaults>
</compile_context>

<pallas_src>
import functools

import jax
import jax.numpy as jnp
import numpy as np
from jax.experimental import pallas as pl
from jax.experimental.pallas import tpu as pltpu

SATURATION_H = 2.0
SATURATION_M = 6.0


def _round_up(x, m):
    return (x + m - 1) // m * m


# --------------------------------------------------------------------------
# Pallas kernel: 2-D memory/forgetting coefficients + embedding scale/bias,
# then one (tb,K)@(K,tn) MXU matmul with V^T and the output sigmoid.
# --------------------------------------------------------------------------
def fk_kernel(bias_ref, f_ref, dl_ref, a_ref, up_ref, vt_ref, o_ref, *,
              approx_recip):
    f = f_ref[...]       # (tb, K)  Fshift
    dl = dl_ref[...]     # (tb, K)  deltashift
    a = a_ref[...]       # (tb, K)  alpha (pre-broadcast per learner)
    up = up_ref[...]     # (tb, K)  <U_past, emb_w> projection

    denom = f + SATURATION_H
    if approx_recip:
        sat = f * pl.reciprocal(denom, approx=True)   # EUP slot (VALU freed)
    else:
        sat = f / denom                               # exact path for validation

    coeff = a * (SATURATION_M * sat) + (1.0 - a) * jnp.exp(-dl)   # (tb, K)
    u_emb = coeff * up + bias_ref[0]                              # (tb, K)

    # inner_product = u_emb @ V.T tile -> (tb, tn); rhs may be bf16 on v6e/v7x.
    rhs = vt_ref[...]                                             # (K, tn)
    inner = jnp.dot(u_emb.astype(rhs.dtype), rhs,
                    preferred_element_type=jnp.float32)
    o_ref[...] = jax.nn.sigmoid(inner).astype(o_ref.dtype)


def fk_pallas(emb_b, f2, dl2, a2, up2, vt_pad, *, tb, tn, approx_recip):
    B, K = f2.shape
    Mp = vt_pad.shape[1]
    nb, nm = B // tb, Mp // tn

    # Double-buffered VMEM footprint estimate; only raise the scoped limit when
    # the tile set outgrows the conservative defaults (16 MiB v5e / 32 MiB v6e,
    # v7x).  Cap at 64 MiB so a scaled-up config still fits v7x physical VMEM.
    step_bytes = (4 * tb * K + tb * tn) * 4 + K * tn * vt_pad.dtype.itemsize
    vmem_limit = None
    if 2 * step_bytes > 12 * 2**20:
        vmem_limit = min(2 * step_bytes + (4 << 20), 64 << 20)

    kernel = functools.partial(fk_kernel, approx_recip=approx_recip)
    return pl.pallas_call(
        kernel,
        out_shape=jax.ShapeDtypeStruct((B, Mp), jnp.float32),
        grid_spec=pltpu.PrefetchScalarGridSpec(
            num_scalar_prefetch=1,                      # emb bias -> SMEM
            grid=(nb, nm),
            in_specs=[
                pl.BlockSpec((tb, K), lambda i, j, b: (i, 0)),   # Fshift
                pl.BlockSpec((tb, K), lambda i, j, b: (i, 0)),   # deltashift
                pl.BlockSpec((tb, K), lambda i, j, b: (i, 0)),   # alpha
                pl.BlockSpec((tb, K), lambda i, j, b: (i, 0)),   # u_proj
                pl.BlockSpec((K, tn), lambda i, j, b: (0, j)),   # V^T tile
            ],
            out_specs=pl.BlockSpec((tb, tn), lambda i, j, b: (i, j)),
        ),
        compiler_params=pltpu.CompilerParams(
            dimension_semantics=("parallel", "parallel"),
            vmem_limit_bytes=vmem_limit),
    )(emb_b, f2, dl2, a2, up2, vt_pad)


# --------------------------------------------------------------------------
# Full forward (matches the value returned by FutureKnowledge.forward)
# --------------------------------------------------------------------------
@functools.partial(jax.jit,
                   static_argnames=("tb", "tn", "approx_recip", "mxu_bf16"))
def future_knowledge_forward(U, V, Fshift, delta, alpha, emb_w, emb_b, *,
                             tb=None, tn=None, approx_recip=True,
                             mxu_bf16=False):
    T, L, K, D = U.shape
    Tm1 = T - 1
    M = V.shape[0]
    B = Tm1 * L

    # NOTE: the PyTorch module also runs LSTM(U[1:]) + out_layer and writes the
    # result into U_shift, which is never read afterwards.  It is dead code
    # w.r.t. the returned y and is intentionally not executed (perf review).

    f2 = Fshift.reshape(B, K).astype(jnp.float32)
    dl2 = delta[1:].reshape(B, K).astype(jnp.float32)
    a2 = jnp.broadcast_to(alpha.astype(jnp.float32)[None, :, None],
                          (Tm1, L, K)).reshape(B, K)

    # Fold the Linear(D=5 -> 1) weight into a (B,K) projection of U_past; the
    # bias stays a single scalar and is scalar-prefetched into SMEM.
    u_proj = jnp.einsum(
        "bkd,d->bk",
        U[:-1].reshape(B, K, D).astype(jnp.float32),
        emb_w.reshape(-1).astype(jnp.float32))

    # Lane-dense V^T: pad num_items to a multiple of 128 so the output store is
    # an unmasked full-lane vst; padded columns are sliced off after the call.
    Mp = _round_up(M, 128)
    vt = jnp.pad(V.T.astype(jnp.float32), ((0, 0), (0, Mp - M)))
    if mxu_bf16:
        vt = vt.astype(jnp.bfloat16)      # MXU-native on v6e/v7x; acc stays f32

    if tb is None:
        tb = B if B <= 1024 else next(
            (c for c in (1024, 512, 256, 128, 64, 32, 16, 8) if B % c == 0), B)
    assert B % tb == 0 and (tb == B or tb % 8 == 0)
    if tn is None:
        tn = Mp if Mp <= 512 else (512 if Mp % 512 == 0 else 128)
    assert Mp % tn == 0 and tn % 128 == 0

    bias = emb_b.reshape(1).astype(jnp.float32)
    y = fk_pallas(bias, f2, dl2, a2, u_proj, vt,
                  tb=tb, tn=tn, approx_recip=approx_recip)
    return y[:, :M].reshape(Tm1, L, M)


# Pure-JAX reference mirroring the PyTorch math, for validation.
def reference_forward(U, V, Fshift, delta, alpha, emb_w, emb_b):
    U_past = U[:-1]
    deltashift = delta[1:]
    ar = alpha.reshape(1, -1, 1, 1)
    mem = ar * U_past * SATURATION_M * (
        Fshift / (Fshift + SATURATION_H))[..., None]
    forg = (1.0 - ar) * U_past * jnp.exp(-deltashift[..., None] / 1.0)
    U_new_shift = mem + forg
    u_emb = jnp.einsum("tlkd,d->tlk", U_new_shift,
                       emb_w.reshape(-1)) + emb_b.reshape(())[None, None, None]
    inner = u_emb @ V.T
    return jax.nn.sigmoid(inner)


if __name__ == "__main__":
    # Small shapes consistent with the module's forward:
    #   U: (T, num_learners, num_kcs, dim=5), V: (num_items, num_kcs)
    #   Fshift: (T-1, L, K), delta: (T, L, K), alpha: (L,)
    T, L, K, D, M = 5, 8, 16, 5, 32

    key = jax.random.PRNGKey(0)
    ks = jax.random.split(key, 7)
    U = jax.random.uniform(ks[0], (T, L, K, D), jnp.float32)
    V = jax.random.normal(ks[1], (M, K), jnp.float32) * 0.1
    Fshift = jax.random.randint(ks[2], (T - 1, L, K), 0, 5).astype(jnp.float32)
    delta = jax.random.randint(ks[3], (T, L, K), 0, 4).astype(jnp.float32)
    alpha = jax.random.uniform(ks[4], (L,), jnp.float32)
    emb_w = jax.random.normal(ks[5], (1, D), jnp.float32) * 0.3   # Linear(5,1).weight
    emb_b = jax.random.normal(ks[6], (1,), jnp.float32) * 0.1     # Linear(5,1).bias

    y_ref = np.asarray(reference_forward(U, V, Fshift, delta, alpha, emb_w, emb_b))

    # 1) Strict numerical validation: exact divide + f32 MXU inputs.
    y = future_knowledge_forward(U, V, Fshift, delta, alpha, emb_w, emb_b,
                                 approx_recip=False, mxu_bf16=False)
    y = jax.block_until_ready(y)
    assert y.shape == (T - 1, L, M)
    np.testing.assert_allclose(np.asarray(y), y_ref, rtol=1e-5, atol=1e-5)

    # 2) Performance path: EUP approximate reciprocal + bf16 MXU inputs
    #    (f32 accumulation).  Looser tolerance covers both approximations.
    y_fast = future_knowledge_forward(U, V, Fshift, delta, alpha, emb_w, emb_b,
                                      approx_recip=True, mxu_bf16=True)
    y_fast = jax.block_until_ready(y_fast)
    np.testing.assert_allclose(np.asarray(y_fast), y_ref, rtol=3e-2, atol=3e-2)

    print("KERNEL_OK")
</pallas_src>

<mosaic_0001>
module attributes {stable_mosaic.version = 11 : i64} {
  func.func @fk_kernel(%arg0: i32, %arg1: i32, %arg2: memref<1xf32, #tpu.memory_space<smem>>, %arg3: memref<32x16xf32, #tpu.memory_space<vmem>>, %arg4: memref<32x16xf32, #tpu.memory_space<vmem>>, %arg5: memref<32x16xf32, #tpu.memory_space<vmem>>, %arg6: memref<32x16xf32, #tpu.memory_space<vmem>>, %arg7: memref<16x128xf32, #tpu.memory_space<vmem>>, %arg8: memref<32x128xf32, #tpu.memory_space<vmem>>) attributes {dimension_semantics = [#tpu.dimension_semantics<parallel>, #tpu.dimension_semantics<parallel>], iteration_bounds = array<i64: 1, 1>, scalar_prefetch = 1 : i64, scratch_operands = 0 : i64, tpu.core_type = #tpu.core_type<tc>, window_params = [{transform_indices = @transform_0, window_bounds = array<i64: 32, 16>}, {transform_indices = @transform_1, window_bounds = array<i64: 32, 16>}, {transform_indices = @transform_2, window_bounds = array<i64: 32, 16>}, {transform_indices = @transform_3, window_bounds = array<i64: 32, 16>}, {transform_indices = @transform_4, window_bounds = array<i64: 16, 128>}, {transform_indices = @transform_5, window_bounds = array<i64: 32, 128>}]} {
    %c0 = arith.constant 0 : index
    %c0_0 = arith.constant 0 : index
    %0 = vector.load %arg3[%c0, %c0_0] : memref<32x16xf32, #tpu.memory_space<vmem>>, vector<32x16xf32>
    %c0_1 = arith.constant 0 : index
    %c0_2 = arith.constant 0 : index
    %1 = vector.load %arg4[%c0_1, %c0_2] : memref<32x16xf32, #tpu.memory_space<vmem>>, vector<32x16xf32>
    %c0_3 = arith.constant 0 : index
    %c0_4 = arith.constant 0 : index
    %2 = vector.load %arg5[%c0_3, %c0_4] : memref<32x16xf32, #tpu.memory_space<vmem>>, vector<32x16xf32>
    %c0_5 = arith.constant 0 : index
    %c0_6 = arith.constant 0 : index
    %3 = vector.load %arg6[%c0_5, %c0_6] : memref<32x16xf32, #tpu.memory_space<vmem>>, vector<32x16xf32>
    %cst = arith.constant 2.000000e+00 : f32
    %4 = vector.broadcast %cst : f32 to vector<32x16xf32>
    %5 = arith.addf %0, %4 : vector<32x16xf32>
    %6 = arith.divf %0, %5 : vector<32x16xf32>
    %cst_7 = arith.constant 6.000000e+00 : f32
    %7 = vector.broadcast %cst_7 : f32 to vector<32x16xf32>
    %8 = arith.mulf %7, %6 : vector<32x16xf32>
    %9 = arith.mulf %2, %8 : vector<32x16xf32>
    %cst_8 = arith.constant 1.000000e+00 : f32
    %10 = vector.broadcast %cst_8 : f32 to vector<32x16xf32>
    %11 = arith.subf %10, %2 : vector<32x16xf32>
    %cst_9 = arith.constant 0.000000e+00 : f32
    %12 = vector.broadcast %cst_9 : f32 to vector<32x16xf32>
    %13 = arith.subf %12, %1 : vector<32x16xf32>
    %14 = math.exp %13 : vector<32x16xf32>
    %15 = arith.mulf %11, %14 : vector<32x16xf32>
    %16 = arith.addf %9, %15 : vector<32x16xf32>
    %17 = arith.mulf %16, %3 : vector<32x16xf32>
    %c0_10 = arith.constant 0 : index
    %18 = memref.load %arg2[%c0_10] : memref<1xf32, #tpu.memory_space<smem>>
    %19 = vector.broadcast %18 : f32 to vector<32x16xf32>
    %20 = arith.addf %17, %19 : vector<32x16xf32>
    %c0_11 = arith.constant 0 : index
    %c0_12 = arith.constant 0 : index
    %21 = vector.load %arg7[%c0_11, %c0_12] : memref<16x128xf32, #tpu.memory_space<vmem>>, vector<16x128xf32>
    %cst_13 = arith.constant dense<0.000000e+00> : vector<32x128xf32>
    %22 = tpu.matmul %20, %21, %cst_13 {dimension_numbers = #tpu.dot_dimension_numbers<[1], [0], [0], [1], [0, 0, 1, 1], [], []>} : vector<32x16xf32>, vector<16x128xf32>, vector<32x128xf32> -> vector<32x128xf32>
    %23 = arith.negf %22 : vector<32x128xf32>
    %24 = math.exp %23 : vector<32x128xf32>
    %cst_14 = arith.constant 1.000000e+00 : f32
    %25 = vector.broadcast %cst_14 : f32 to vector<32x128xf32>
    %26 = arith.addf %25, %24 : vector<32x128xf32>
    %27 = arith.divf %25, %26 : vector<32x128xf32>
    %c0_15 = arith.constant 0 : index
    %c0_16 = arith.constant 0 : index
    %28 = vector.load %arg8[%c0_15, %c0_16] : memref<32x128xf32, #tpu.memory_space<vmem>>, vector<32x128xf32>
    tpu.vector_store %arg8[%c0_15, %c0_16], %27 {strides = array<i32>} : memref<32x128xf32, #tpu.memory_space<vmem>>, vector<32x128xf32>,
    return
  }
  func.func @transform_0(%arg0: i32, %arg1: i32, %arg2: memref<1xf32, #tpu.memory_space<smem>>) -> (i32, i32) {
    %c0_i32 = arith.constant 0 : i32
    %c0_i32_0 = arith.constant 0 : i32
    return %arg0, %c0_i32 : i32, i32
  }
  func.func @transform_1(%arg0: i32, %arg1: i32, %arg2: memref<1xf32, #tpu.memory_space<smem>>) -> (i32, i32) {
    %c0_i32 = arith.constant 0 : i32
    %c0_i32_0 = arith.constant 0 : i32
    return %arg0, %c0_i32 : i32, i32
  }
  func.func @transform_2(%arg0: i32, %arg1: i32, %arg2: memref<1xf32, #tpu.memory_space<smem>>) -> (i32, i32) {
    %c0_i32 = arith.constant 0 : i32
    %c0_i32_0 = arith.constant 0 : i32
    return %arg0, %c0_i32 : i32, i32
  }
  func.func @transform_3(%arg0: i32, %arg1: i32, %arg2: memref<1xf32, #tpu.memory_space<smem>>) -> (i32, i32) {
    %c0_i32 = arith.constant 0 : i32
    %c0_i32_0 = arith.constant 0 : i32
    return %arg0, %c0_i32 : i32, i32
  }
  func.func @transform_4(%arg0: i32, %arg1: i32, %arg2: memref<1xf32, #tpu.memory_space<smem>>) -> (i32, i32) {
    %c0_i32 = arith.constant 0 : i32
    %c0_i32_0 = arith.constant 0 : i32
    return %c0_i32, %arg1 : i32, i32
  }
  func.func @transform_5(%arg0: i32, %arg1: i32, %arg2: memref<1xf32, #tpu.memory_space<smem>>) -> (i32, i32) {
    %c0_i32 = arith.constant 0 : i32
    return %arg0, %arg1 : i32, i32
  }
}

</mosaic_0001>

<bundles_post_ra>
// kernel: future_knowledge_forward.1
= control target key start
LH: loop header
LB: loop body
LE: loop exit
PB: predicated region body
PF: predicated region fallthrough
CT: control target
= control target key end

     0   :  { %vm94_vm0 = vcmask 130048   ;;  %s394_s5 = inlined_call_operand.vmem [shape: f32[16,128], index: 5, kind: input, shape index: {}]   ;;  %s395_s1 = inlined_call_operand.vmem [shape: f32[32,16], index: 1, kind: input, shape index: {}]   ;;  %s396_s2 = inlined_call_operand.vmem [shape: f32[32,16], index: 2, kind: input, shape index: {}]   ;;  %s397_s3 = inlined_call_operand.vmem [shape: f32[32,16], index: 3, kind: input, shape index: {}]   ;;  %s398_s4 = inlined_call_operand.vmem [shape: f32[32,16], index: 4, kind: input, shape index: {}]   ;;  %s399_s0 = inlined_call_operand.<no memory space> [shape: f32[1], index: 0, kind: input, shape index: {}]   ;;  %s400_s6 = inlined_call_operand.vmem [shape: f32[32,128], index: 6, kind: output, shape index: {}]  }
   0x1   :  { %v92_v0 = vld [vmem:[%s394_s5] sm:$0xff]  ;;  %v93_v1 = vld [vmem:[%s394_s5 + $0x8] sm:$0xff]  ;;  %v24_v7 = vld [vmem:[%s395_s1 + $0x10] sm:$0xff]  ;;  %v87_v50 = vstv %s399_s0 }
   0x2   :  { %v22_v2 = vld [vmem:[%s395_s1] sm:$0xff]  ;;  %v248_v3 = vpack.c.bf16 %v93_v1, %v92_v0  ;;  %v28_v8 = vld [vmem:[%s396_s2 + $0x10] sm:$0xff]  ;;  %v40_v9 = vadd.f32 2.0, %v24_v7  ;;  %v23_v11 = vld [vmem:[%s395_s1 + $0x8] sm:$0xff] }
   0x3   :  { %v26_v4 = vld [vmem:[%s396_s2] sm:$0xff]  ;;  %v38_v5 = vadd.f32 2.0, %v22_v2  ;;  %v64_v10 = vsub.f32 0.0, %v28_v8  ;;  %v27_v12 = vld [vmem:[%s396_s2 + $0x8] sm:$0xff]  ;;  %v39_v14 = vadd.f32 2.0, %v23_v11  ;;  %v25_v17 = vld [vmem:[%s395_s1 + $0x18] sm:$0xff] }
   0x4   :  { %v62_v6 = vsub.f32 0.0, %v26_v4  ;;  %249 = vmatprep.subr.bf16.mxu0 %v248_v3  ;;  %252 = vmatprep.subr.bf16.mxu1 %v248_v3  ;;  %v63_v15 = vsub.f32 0.0, %v27_v12  ;;  %v29_v18 = vld [vmem:[%s396_s2 + $0x18] sm:$0xff]  ;;  %v41_v20 = vadd.f32 2.0, %v25_v17  ;;  %v30_v23 = vld [vmem:[%s397_s3] sm:$0xff]  ;;  %v32_v24 = vld [vmem:[%s397_s3 + $0x10] sm:$0xff] }
   0x5   :  { %254 = vrcp.f32 %v38_v5  ;;  %251 = vmatpush3.bf16.msra.mxu0 %v248_v3  ;;  %253 = vmatpush3.bf16.msra.mxu1 %v248_v3  ;;  %v70_v16 = vmul.f32 1.442695, %v64_v10  ;;  %v65_v21 = vsub.f32 0.0, %v29_v18  ;;  %v58_v26 = vsub.f32 1.0, %v30_v23  ;;  %v31_v29 = vld [vmem:[%s397_s3 + $0x8] sm:$0xff]  ;;  %v33_v34 = vld [vmem:[%s397_s3 + $0x18] sm:$0xff] }
   0x6   :  { %v66_v13 = vmul.f32 1.442695, %v62_v6  ;;  %256 = vrcp.f32 %v40_v9  ;;  %v68_v19 = vmul.f32 1.442695, %v63_v15  ;;  %v60_v28 = vsub.f32 1.0, %v32_v24  ;;  %v34_v43 = vld [vmem:[%s398_s4] sm:$0xff] }
   0x7   :  { %v72_v22 = vmul.f32 1.442695, %v65_v21  ;;  %v59_v37 = vsub.f32 1.0, %v31_v29  ;;  %v61_v45 = vsub.f32 1.0, %v33_v34  ;;  %v36_v51 = vld [vmem:[%s398_s4 + $0x10] sm:$0xff]  ;;  %v35_v62 = vld [vmem:[%s398_s4 + $0x8] sm:$0xff] }
   0x8   :  { %258 = vpow2.f32 %v66_v13 }
   0x9   :  { %260 = vpow2.f32 %v70_v16 }
   0xa   :  { %262 = vrcp.f32 %v39_v14 }
   0xb   :  { %264 = vpow2.f32 %v68_v19 }
   0xc   :  { %266 = vrcp.f32 %v41_v20 }
   0xd   :  { %268 = vpow2.f32 %v72_v22 }
   0xf   :  { %v255_v25 = vpop.eup %254 }
  0x10   :  { %v43_v27 = vmul.f32 %v255_v25, %v22_v2  ;;  %v257_v30 = vpop.eup %256  ;;  %v37_v2 = vld [vmem:[%s398_s4 + $0x18] sm:$0xff] }
  0x11   :  { %v47_v33 = vmul.f32 %v257_v30, %v24_v7 }
  0x12   :  { %v259_v31 = vpop.eup %258  ;;  %v50_v32 = vmul.f32 6.0, %v43_v27 }
  0x13   :  { %v261_v35 = vpop.eup %260  ;;  %v74_v36 = vmul.f32 %v259_v31, %v58_v26  ;;  %v52_v40 = vmul.f32 6.0, %v47_v33 }
  0x14   :  { %v263_v38 = vpop.eup %262  ;;  %v54_v39 = vmul.f32 %v50_v32, %v30_v23  ;;  %v76_v41 = vmul.f32 %v261_v35, %v60_v28 }
  0x15   :  { %v265_v42 = vpop.eup %264  ;;  %v45_v44 = vmul.f32 %v263_v38, %v23_v11  ;;  %v56_v48 = vmul.f32 %v52_v40, %v32_v24 }
  0x16   :  { %v267_v46 = vpop.eup %266  ;;  %v78_v47 = vadd.f32 %v74_v36, %v54_v39  ;;  %v75_v53 = vmul.f32 %v265_v42, %v59_v37 }
  0x17   :  { %v269_v49 = vpop.eup %268  ;;  %v51_v52 = vmul.f32 6.0, %v45_v44  ;;  %v49_v54 = vmul.f32 %v267_v46, %v25_v17  ;;  %v80_v56 = vadd.f32 %v76_v41, %v56_v48 }
  0x18   :  { %v82_v55 = vmul.f32 %v78_v47, %v34_v43  ;;  %v77_v59 = vmul.f32 %v269_v49, %v61_v45 }
  0x19   :  { %v55_v57 = vmul.f32 %v51_v52, %v31_v29  ;;  %v53_v58 = vmul.f32 6.0, %v49_v54  ;;  %v84_v61 = vmul.f32 %v80_v56, %v36_v51 }
  0x1a   :  { %v88_v60 = vadd.f32 %v87_v50, %v82_v55 }
  0x1b   :  { %v79_v63 = vadd.f32 %v75_v53, %v55_v57  ;;  %v57_v0 = vmul.f32 %v53_v58, %v33_v34  ;;  %v90_v1 = vadd.f32 %v87_v50, %v84_v61 }
  0x1c   :  { %242 = vmatprep.mubr.msk.f32.mxu0 %vm94_vm0, %v88_v60 }
  0x1d   :  { %v83_v3 = vmul.f32 %v79_v63, %v35_v62  ;;  %v81_v4 = vadd.f32 %v77_v59, %v57_v0  ;;  %245 = vmatprep.mubr.msk.f32.mxu1 %vm94_vm0, %v90_v1 }
  0x1f   :  { %v89_v5 = vadd.f32 %v87_v50, %v83_v3  ;;  %v85_v6 = vmul.f32 %v81_v4, %v37_v2 }
  0x21   :  { %243 = vmatmul.mubr.msk.f32.vlgmr.msra.gmra.mrb[0].mxu0 %vm94_vm0, %v89_v5  ;;  %v91_v7 = vadd.f32 %v87_v50, %v85_v6 }
  0x23   :  { %246 = vmatmul.mubr.msk.f32.vlgmr.msra.gmra.mrb[0].mxu1 %vm94_vm0, %v91_v7 }
  0xf4   :  { %v244_v8 = vpop.f32.mrb[0].mxu0 }
  0xf5   :  { %v229_v9 = vmul.f32 -1.442695, %v244_v8  ;;  %v173_v10 = vpop.f32.mrb[1].mxu0 }
  0xf6   :  { %v247_v11 = vpop.f32.mrb[0].mxu1  ;;  %v228_v12 = vmul.f32 -1.442695, %v173_v10 }
  0xf7   :  { %270 = vpow2.f32 %v229_v9  ;;  %v231_v13 = vmul.f32 -1.442695, %v247_v11  ;;  %v183_v14 = vpop.f32.mrb[1].mxu1 }
  0xf8   :  { %272 = vpow2.f32 %v228_v12  ;;  %v230_v15 = vmul.f32 -1.442695, %v183_v14 }
  0xf9   :  { %274 = vpow2.f32 %v231_v13 }
  0xfa   :  { %276 = vpow2.f32 %v230_v15 }
 0x101   :  { %v271_v16 = vpop.eup %270 }
 0x102   :  { %v273_v17 = vpop.eup %272  ;;  %v205_v18 = vadd.f32 1.0, %v271_v16 }
 0x103   :  { %v275_v19 = vpop.eup %274  ;;  %v204_v20 = vadd.f32 1.0, %v273_v17 }
 0x104   :  { %v277_v21 = vpop.eup %276  ;;  %278 = vrcp.f32 %v205_v18  ;;  %v207_v22 = vadd.f32 1.0, %v275_v19 }
 0x105   :  { %280 = vrcp.f32 %v204_v20  ;;  %v206_v23 = vadd.f32 1.0, %v277_v21 }
 0x106   :  { %282 = vrcp.f32 %v207_v22 }
 0x107   :  { %284 = vrcp.f32 %v206_v23 }
 0x10e   :  { %v279_v24 = vpop.eup %278 }
 0x10f   :  { %v281_v25 = vpop.eup %280  ;;  %217 = vst [vmem:[%s400_s6 + $0x8] sm:$0xff] %v279_v24 }
 0x110   :  { %v283_v26 = vpop.eup %282  ;;  %216 = vst [vmem:[%s400_s6] sm:$0xff] %v281_v25 }
 0x111   :  { %v285_v27 = vpop.eup %284  ;;  %219 = vst [vmem:[%s400_s6 + $0x18] sm:$0xff] %v283_v26 }
 0x112   :  { %218 = vst [vmem:[%s400_s6 + $0x10] sm:$0xff] %v285_v27 }

</bundles_post_ra>
